<compile_context>
chip_gen: v7x
topology: tpu7x:2x2x1
jax: 0.10.0
libtpu: 0.0.40
codegen_flags: <defaults>
</compile_context>

<pallas_src>
import functools

import numpy as np
import jax
import jax.numpy as jnp
from jax import lax
from jax.experimental import pallas as pl
from jax.experimental.pallas import tpu as pltpu


def _round_up(a, b):
    return (a + b - 1) // b * b


# ----------------------------------------------------------------------------
# Kernel 1 (tiny, one grid step): power iteration + sigma on the resident
# f32 transposed weight.  Outputs u_new, v_new and 1/sigma.
# ----------------------------------------------------------------------------
def _power_iter_sigma_kernel(wt_ref, u_ref, u_out_ref, v_out_ref,
                             inv_sigma_ref, *, power_iterations, eps):
    wt = wt_ref[...]                                   # (K, Np) f32, N-padded
    u = u_ref[...]                                     # (1, Np)

    v = None
    for _ in range(power_iterations):
        # v = l2normalize(W^T u): contract over N (lane axis of both operands)
        v = lax.dot_general(u, wt, (((1,), (1,)), ((), ())),
                            preferred_element_type=jnp.float32)        # (1, K)
        v_nrm = jnp.sqrt(jnp.sum(v * v, keepdims=True))                # (1, 1)
        v = v * (1.0 / (v_nrm + eps))
        # u = l2normalize(W v): plain (1,K)@(K,Np)
        u = jnp.dot(v, wt, preferred_element_type=jnp.float32)         # (1, Np)
        u_nrm = jnp.sqrt(jnp.sum(u * u, keepdims=True))                # (1, 1)
        u = u * (1.0 / (u_nrm + eps))

    # sigma = u . (W v)
    wv = jnp.dot(v, wt, preferred_element_type=jnp.float32)            # (1, Np)
    sigma = jnp.sum(u * wv, keepdims=True)                             # (1, 1)

    u_out_ref[...] = u.astype(u_out_ref.dtype)
    v_out_ref[...] = v.astype(v_out_ref.dtype)
    inv_sigma_ref[...] = (1.0 / sigma).astype(inv_sigma_ref.dtype)


# ----------------------------------------------------------------------------
# Kernel 2 (main, tiled over M, "parallel"): y = (x @ W^T) * (1/sigma) + b.
# Weight arrives pre-transposed (K, Np) and already in the MXU dtype; the x
# tile is cast in-kernel (no extra wrapper HBM pass over x).
# ----------------------------------------------------------------------------
def _scaled_linear_kernel(x_ref, wt_ref, b_ref, inv_sigma_ref, y_ref,
                          *, mxu_dtype):
    inv_sigma = inv_sigma_ref[0, 0]                    # scalar from SMEM
    x = x_ref[...].astype(mxu_dtype)                   # (tm, K)
    y = jnp.dot(x, wt_ref[...],
                preferred_element_type=jnp.float32)    # (tm, Np) f32 acc
    y_ref[...] = (y * inv_sigma + b_ref[...]).astype(y_ref.dtype)


def _pick_tm(M, K, Np, x_itemsize, y_itemsize, w_bytes, budget=24 << 20):
    """Largest M tile (multiple of 8, <=512) fitting a conservative VMEM
    budget that also holds on v7x (64 MiB physical): double-buffered x/y
    tiles + double-buffered resident weight + bias."""
    if M < 8:
        return M
    tm_cap = min(512, (M // 8) * 8)
    per_row = 2 * (K * x_itemsize + Np * y_itemsize)       # x + y, 2 buffers
    avail = max(budget - 2 * w_bytes - 2 * Np * 4, per_row * 8)
    tm_budget = max(8, (avail // per_row) // 8 * 8)
    return int(min(tm_cap, tm_budget))


# ----------------------------------------------------------------------------
# Wrapper.
# ----------------------------------------------------------------------------
def spectral_norm_linear(x, w_bar, b, u, v=None, *, power_iterations=1,
                         eps=1e-12, mxu_dtype=jnp.bfloat16):
    """SpectralNorm(nn.Linear).forward.  Returns (y, u_new, v_new).

    `v` is accepted for state parity with the PyTorch module but never read
    (torch overwrites v before its first use when power_iterations >= 1).
    `mxu_dtype` controls the operand dtype of the big matmul only; the power
    iteration, sigma and accumulation are always f32.
    """
    assert power_iterations >= 1
    del v  # not read by the torch forward either

    M, K = x.shape
    N, K2 = w_bar.shape
    assert K == K2 and b.shape == (N,) and u.shape == (N,)

    f32 = jnp.float32
    Np = _round_up(max(N, 1), 128)        # lane-dense output / weight columns

    # Small, amortized wrapper work: transpose + N-pad the weight once,
    # N-pad u and b.  Zero padding along N is mathematically inert for the
    # norms, sigma and y (padded y columns are sliced off).
    wt_f32 = jnp.zeros((K, Np), f32).at[:, :N].set(w_bar.astype(f32).T)
    u_p = jnp.zeros((1, Np), f32).at[0, :N].set(u.astype(f32))
    b_p = jnp.zeros((1, Np), f32).at[0, :N].set(b.astype(f32))

    # ---- call 1: power iteration + sigma (runs once) -----------------------
    pi_kernel = functools.partial(_power_iter_sigma_kernel,
                                  power_iterations=power_iterations, eps=eps)
    u_new_p, v_new_p, inv_sigma = pl.pallas_call(
        pi_kernel,
        grid=(1,),
        in_specs=[
            pl.BlockSpec((K, Np), lambda i: (0, 0)),    # W^T (f32)
            pl.BlockSpec((1, Np), lambda i: (0, 0)),    # u
        ],
        out_specs=[
            pl.BlockSpec((1, Np), lambda i: (0, 0)),    # u_new
            pl.BlockSpec((1, K), lambda i: (0, 0)),     # v_new
            pl.BlockSpec((1, 1), lambda i: (0, 0)),     # 1/sigma
        ],
        out_shape=[
            jax.ShapeDtypeStruct((1, Np), f32),
            jax.ShapeDtypeStruct((1, K), f32),
            jax.ShapeDtypeStruct((1, 1), f32),
        ],
        compiler_params=pltpu.CompilerParams(
            dimension_semantics=("arbitrary",),
            vmem_limit_bytes=32 * 1024 * 1024),
    )(wt_f32, u_p)

    # ---- call 2: y = (x @ W^T) / sigma + b, tiled over M, megacore-parallel
    wt_mxu = wt_f32.astype(mxu_dtype)                   # one-time cast (small)
    w_bytes = K * Np * wt_mxu.dtype.itemsize
    tm = _pick_tm(M, K, Np, x.dtype.itemsize, x.dtype.itemsize, w_bytes)
    grid_m = pl.cdiv(M, tm)

    flops = 2 * M * N * K
    bytes_accessed = (M * K * x.dtype.itemsize          # x
                      + K * Np * wt_mxu.dtype.itemsize  # W^T
                      + Np * 4 + 4                      # bias + 1/sigma
                      + M * Np * x.dtype.itemsize)      # y

    lin_kernel = functools.partial(_scaled_linear_kernel, mxu_dtype=mxu_dtype)
    y_full = pl.pallas_call(
        lin_kernel,
        grid=(grid_m,),
        in_specs=[
            pl.BlockSpec((tm, K), lambda i: (i, 0)),    # x tile (unpadded)
            pl.BlockSpec((K, Np), lambda i: (0, 0)),    # W^T (resident)
            pl.BlockSpec((1, Np), lambda i: (0, 0)),    # bias (resident)
            pl.BlockSpec(memory_space=pltpu.MemorySpace.SMEM),  # 1/sigma
        ],
        out_specs=pl.BlockSpec((tm, Np), lambda i: (i, 0)),
        out_shape=jax.ShapeDtypeStruct((M, Np), x.dtype),
        compiler_params=pltpu.CompilerParams(
            dimension_semantics=("parallel",),
            vmem_limit_bytes=32 * 1024 * 1024),
        cost_estimate=pl.CostEstimate(flops=int(flops), transcendentals=0,
                                      bytes_accessed=int(bytes_accessed)),
    )(x, wt_mxu, b_p, inv_sigma)

    y = y_full if Np == N else y_full[:, :N]
    u_new = u_new_p[0, :N]
    v_new = v_new_p[0, :]
    return y, u_new, v_new


# ----------------------------------------------------------------------------
# Independent numpy (float64) reference mirroring the torch module exactly.
# ----------------------------------------------------------------------------
def reference_numpy(x, w, b, u, power_iterations=1, eps=1e-12):
    x = np.asarray(x, np.float64)
    w = np.asarray(w, np.float64)
    b = np.asarray(b, np.float64)
    u = np.asarray(u, np.float64)
    v = None
    for _ in range(power_iterations):
        v = w.T @ u
        v = v / (np.linalg.norm(v) + eps)
        u = w @ v
        u = u / (np.linalg.norm(u) + eps)
    sigma = u @ (w @ v)
    w_sn = w / sigma
    y = x @ w_sn.T + b
    return y.astype(np.float32), u.astype(np.float32), v.astype(np.float32)


if __name__ == "__main__":
    key = jax.random.PRNGKey(0)
    k1, k2, k3, k4, k5 = jax.random.split(key, 5)

    batch, in_features, out_features = 8, 32, 64
    x = jax.random.normal(k1, (batch, in_features), dtype=jnp.float32)
    w_bar = 0.1 * jax.random.normal(k2, (out_features, in_features),
                                    dtype=jnp.float32)
    b = 0.1 * jax.random.normal(k3, (out_features,), dtype=jnp.float32)
    # _make_params: u, v ~ N(0,1) then l2-normalized.
    u0 = jax.random.normal(k4, (out_features,), dtype=jnp.float32)
    v0 = jax.random.normal(k5, (in_features,), dtype=jnp.float32)
    u0 = u0 / (jnp.linalg.norm(u0) + 1e-12)
    v0 = v0 / (jnp.linalg.norm(v0) + 1e-12)

    # Full-f32 MXU path (tight tolerance) and bf16-operand MXU path (fast).
    y32, u32, v32 = spectral_norm_linear(x, w_bar, b, u0, v0,
                                         power_iterations=1,
                                         mxu_dtype=jnp.float32)
    ybf, ubf, vbf = spectral_norm_linear(x, w_bar, b, u0, v0,
                                         power_iterations=1,
                                         mxu_dtype=jnp.bfloat16)
    jax.block_until_ready((y32, ybf, u32, v32))

    assert y32.shape == (batch, out_features) and y32.dtype == x.dtype
    assert ybf.shape == (batch, out_features) and ybf.dtype == x.dtype

    y_ref, u_ref, v_ref = reference_numpy(np.asarray(x), np.asarray(w_bar),
                                          np.asarray(b), np.asarray(u0),
                                          power_iterations=1)

    assert np.allclose(np.asarray(y32), y_ref, atol=1e-4, rtol=1e-4)
    assert np.allclose(np.asarray(u32), u_ref, atol=1e-5, rtol=1e-5)
    assert np.allclose(np.asarray(v32), v_ref, atol=1e-5, rtol=1e-5)
    # bf16 operands, f32 accumulation / spectral scale: looser y tolerance.
    assert np.allclose(np.asarray(ybf), y_ref, atol=2e-2, rtol=2e-2)
    assert np.allclose(np.asarray(ubf), u_ref, atol=1e-5, rtol=1e-5)
    assert np.allclose(np.asarray(vbf), v_ref, atol=1e-5, rtol=1e-5)

    print("KERNEL_OK")
</pallas_src>

<mosaic_0001>
module attributes {stable_mosaic.version = 11 : i64} {
  func.func @_power_iter_sigma_kernel(%arg0: i32, %arg1: memref<32x128xf32, #tpu.memory_space<vmem>>, %arg2: memref<1x128xf32, #tpu.memory_space<vmem>>, %arg3: memref<1x128xf32, #tpu.memory_space<vmem>>, %arg4: memref<1x32xf32, #tpu.memory_space<vmem>>, %arg5: memref<1x1xf32, #tpu.memory_space<vmem>>) attributes {dimension_semantics = [#tpu.dimension_semantics<arbitrary>], iteration_bounds = array<i64: 1>, scalar_prefetch = 0 : i64, scratch_operands = 0 : i64, tpu.core_type = #tpu.core_type<tc>, window_params = [{pipeline_mode = #tpu.pipeline_mode<synchronous>, transform_indices = @transform_0, window_bounds = array<i64: 32, 128>}, {pipeline_mode = #tpu.pipeline_mode<synchronous>, transform_indices = @transform_1, window_bounds = array<i64: 1, 128>}, {pipeline_mode = #tpu.pipeline_mode<synchronous>, transform_indices = @transform_2, window_bounds = array<i64: 1, 128>}, {pipeline_mode = #tpu.pipeline_mode<synchronous>, transform_indices = @transform_3, window_bounds = array<i64: 1, 32>}, {pipeline_mode = #tpu.pipeline_mode<synchronous>, transform_indices = @transform_4, window_bounds = array<i64: 1, 1>}]} {
    %c0 = arith.constant 0 : index
    %c0_0 = arith.constant 0 : index
    %0 = vector.load %arg1[%c0, %c0_0] : memref<32x128xf32, #tpu.memory_space<vmem>>, vector<32x128xf32>
    %c0_1 = arith.constant 0 : index
    %c0_2 = arith.constant 0 : index
    %1 = vector.load %arg2[%c0_1, %c0_2] : memref<1x128xf32, #tpu.memory_space<vmem>>, vector<1x128xf32>
    %cst = arith.constant dense<0.000000e+00> : vector<1x32xf32>
    %2 = tpu.matmul %1, %0, %cst {dimension_numbers = #tpu.dot_dimension_numbers<[1], [1], [0], [0], [0, 0, 1, 0], [], []>} : vector<1x128xf32>, vector<32x128xf32>, vector<1x32xf32> -> vector<1x32xf32>
    %3 = arith.mulf %2, %2 : vector<1x32xf32>
    %4 = vector.shape_cast %3 : vector<1x32xf32> to vector<1x1x32xf32>
    %cst_3 = arith.constant dense<0.000000e+00> : vector<1xf32>
    %5 = vector.multi_reduction <add>, %4, %cst_3 [1, 2] : vector<1x1x32xf32> to vector<1xf32>
    %6 = vector.shape_cast %5 : vector<1xf32> to vector<1x1x1xf32>
    %7 = vector.extract %6[0, 0, 0] : f32 from vector<1x1x1xf32>
    %8 = vector.broadcast %7 : f32 to vector<1x1xf32>
    %9 = math.sqrt %8 : vector<1x1xf32>
    %cst_4 = arith.constant 9.99999996E-13 : f32
    %10 = vector.broadcast %cst_4 : f32 to vector<1x1xf32>
    %11 = arith.addf %9, %10 : vector<1x1xf32>
    %cst_5 = arith.constant 1.000000e+00 : f32
    %12 = vector.broadcast %cst_5 : f32 to vector<1x1xf32>
    %13 = arith.divf %12, %11 : vector<1x1xf32>
    %14 = vector.broadcast %13 : vector<1x1xf32> to vector<1x32xf32>
    %15 = arith.mulf %2, %14 : vector<1x32xf32>
    %cst_6 = arith.constant dense<0.000000e+00> : vector<1x128xf32>
    %16 = tpu.matmul %15, %0, %cst_6 {dimension_numbers = #tpu.dot_dimension_numbers<[1], [0], [0], [1], [0, 0, 1, 1], [], []>} : vector<1x32xf32>, vector<32x128xf32>, vector<1x128xf32> -> vector<1x128xf32>
    %17 = arith.mulf %16, %16 : vector<1x128xf32>
    %18 = vector.shape_cast %17 : vector<1x128xf32> to vector<1x1x128xf32>
    %cst_7 = arith.constant dense<0.000000e+00> : vector<1xf32>
    %19 = vector.multi_reduction <add>, %18, %cst_7 [1, 2] : vector<1x1x128xf32> to vector<1xf32>
    %20 = vector.shape_cast %19 : vector<1xf32> to vector<1x1x1xf32>
    %21 = vector.extract %20[0, 0, 0] : f32 from vector<1x1x1xf32>
    %22 = vector.broadcast %21 : f32 to vector<1x1xf32>
    %23 = math.sqrt %22 : vector<1x1xf32>
    %cst_8 = arith.constant 9.99999996E-13 : f32
    %24 = vector.broadcast %cst_8 : f32 to vector<1x1xf32>
    %25 = arith.addf %23, %24 : vector<1x1xf32>
    %cst_9 = arith.constant 1.000000e+00 : f32
    %26 = vector.broadcast %cst_9 : f32 to vector<1x1xf32>
    %27 = arith.divf %26, %25 : vector<1x1xf32>
    %28 = vector.broadcast %27 : vector<1x1xf32> to vector<1x128xf32>
    %29 = arith.mulf %16, %28 : vector<1x128xf32>
    %cst_10 = arith.constant dense<0.000000e+00> : vector<1x128xf32>
    %30 = tpu.matmul %15, %0, %cst_10 {dimension_numbers = #tpu.dot_dimension_numbers<[1], [0], [0], [1], [0, 0, 1, 1], [], []>} : vector<1x32xf32>, vector<32x128xf32>, vector<1x128xf32> -> vector<1x128xf32>
    %31 = arith.mulf %29, %30 : vector<1x128xf32>
    %32 = vector.shape_cast %31 : vector<1x128xf32> to vector<1x1x128xf32>
    %cst_11 = arith.constant dense<0.000000e+00> : vector<1xf32>
    %33 = vector.multi_reduction <add>, %32, %cst_11 [1, 2] : vector<1x1x128xf32> to vector<1xf32>
    %34 = vector.shape_cast %33 : vector<1xf32> to vector<1x1x1xf32>
    %35 = vector.extract %34[0, 0, 0] : f32 from vector<1x1x1xf32>
    %36 = vector.broadcast %35 : f32 to vector<1x1xf32>
    %c0_12 = arith.constant 0 : index
    %c0_13 = arith.constant 0 : index
    %37 = vector.load %arg3[%c0_12, %c0_13] : memref<1x128xf32, #tpu.memory_space<vmem>>, vector<1x128xf32>
    tpu.vector_store %arg3[%c0_12, %c0_13], %29 {strides = array<i32>} : memref<1x128xf32, #tpu.memory_space<vmem>>, vector<1x128xf32>,
    %c0_14 = arith.constant 0 : index
    %c0_15 = arith.constant 0 : index
    %38 = vector.load %arg4[%c0_14, %c0_15] : memref<1x32xf32, #tpu.memory_space<vmem>>, vector<1x32xf32>
    tpu.vector_store %arg4[%c0_14, %c0_15], %15 {strides = array<i32>} : memref<1x32xf32, #tpu.memory_space<vmem>>, vector<1x32xf32>,
    %cst_16 = arith.constant 1.000000e+00 : f32
    %39 = vector.broadcast %cst_16 : f32 to vector<1x1xf32>
    %40 = arith.divf %39, %36 : vector<1x1xf32>
    %c0_17 = arith.constant 0 : index
    %c0_18 = arith.constant 0 : index
    %41 = vector.load %arg5[%c0_17, %c0_18] : memref<1x1xf32, #tpu.memory_space<vmem>>, vector<1x1xf32>
    tpu.vector_store %arg5[%c0_17, %c0_18], %40 {strides = array<i32>} : memref<1x1xf32, #tpu.memory_space<vmem>>, vector<1x1xf32>,
    return
  }
  func.func @transform_0(%arg0: i32) -> (i32, i32) {
    %c0_i32 = arith.constant 0 : i32
    %c0_i32_0 = arith.constant 0 : i32
    %c0_i32_1 = arith.constant 0 : i32
    return %c0_i32, %c0_i32_0 : i32, i32
  }
  func.func @transform_1(%arg0: i32) -> (i32, i32) {
    %c0_i32 = arith.constant 0 : i32
    %c0_i32_0 = arith.constant 0 : i32
    %c0_i32_1 = arith.constant 0 : i32
    return %c0_i32, %c0_i32_0 : i32, i32
  }
  func.func @transform_2(%arg0: i32) -> (i32, i32) {
    %c0_i32 = arith.constant 0 : i32
    %c0_i32_0 = arith.constant 0 : i32
    %c0_i32_1 = arith.constant 0 : i32
    return %c0_i32, %c0_i32_0 : i32, i32
  }
  func.func @transform_3(%arg0: i32) -> (i32, i32) {
    %c0_i32 = arith.constant 0 : i32
    %c0_i32_0 = arith.constant 0 : i32
    %c0_i32_1 = arith.constant 0 : i32
    return %c0_i32, %c0_i32_0 : i32, i32
  }
  func.func @transform_4(%arg0: i32) -> (i32, i32) {
    %c0_i32 = arith.constant 0 : i32
    %c0_i32_0 = arith.constant 0 : i32
    %c0_i32_1 = arith.constant 0 : i32
    return %c0_i32, %c0_i32_0 : i32, i32
  }
}

</mosaic_0001>

<bundles_post_ra>
// kernel: tpu_custom_call.1
= control target key start
LH: loop header
LB: loop body
LE: loop exit
PB: predicated region body
PF: predicated region fallthrough
CT: control target
= control target key end

     0   :  { %10 = vsyncpa [#allocation3], 0  ;;  %s540_s0 = inlined_call_operand.hbm [shape: f32[32,128], index: 0, kind: input, shape index: {}]   ;;  %s541_s1 = inlined_call_operand.vmem [shape: f32[1,128], index: 1, kind: input, shape index: {}]   ;;  %s542_s2 = inlined_call_operand.hbm [shape: f32[1,128], index: 2, kind: output, shape index: {0}]   ;;  %s543_s3 = inlined_call_operand.hbm [shape: f32[1,32], index: 3, kind: output, shape index: {1}]   ;;  %s544_s4 = inlined_call_operand.hbm [shape: f32[1,1], index: 4, kind: output, shape index: {2}]  }
   0x1   :  { %11 = vsyncpa [#allocation4], 0 }
   0x2   :  { %12 = vsyncpa [#allocation7], 0  ;;  %s451_s15 = smov [#allocation2]   ;;  %s357_s19 = scalar_lea.hbm %s540_s0, 512 }
   0x3   :  { %s18_s16 = sshll.u32 %s451_s15, 4  ;;  %p358_p0 = scmp.ne.s32.totalorder %s540_s0, %s357_s19  ;;  %s19_s16 = int_to_ptr.vmem [resolvable:$true] %s18_s16 }
   0x4   :  { %p361_p1 = scmp.lt.u32.totalorder %s357_s19, %s540_s0 }
   0x6   :  { %p363_p2 = pnand %p361_p1, %p358_p0 }
   0x8   :  { %366 = shalt.err (!%p363_p2)
}
   0x9   :  { %s367_s24 = scalar_lea.vmem %s19_s16, 512  ;;  %p372_p4 = scmp.lt.s32.totalorder %s19_s16, %s19_s16 }
   0xa   :  { %p368_p3 = scmp.ne.s32.totalorder %s19_s16, %s367_s24  ;;  %p373_p5 = scmp.lt.s32.totalorder %s367_s24, %s367_s24 }
   0xc   :  { %p374_p6 = por %p373_p5, %p372_p4 }
   0xe   :  { %p375_p7 = pnand %p374_p6, %p368_p3 }
  0x10   :  { %378 = shalt.err (!%p375_p7)
}
  0x11   :  { %s452_s25 = smov 128   ;;  %s453_s26 = smov 8  }
  0x12   :  { %24 = dma.hbm_to_vmem [thread:$0]  %s540_s0, 512, %s19_s16, [#allocation3], %s452_s25, %s452_s25, %s453_s26  }
  0x13   :  { %445 = dma.done.wait [#allocation3], 512  }
  0x14   :  { %446 = vsyncadd [#allocation3], 4294966784  ;;  %v454_v0 = vmov 0.0|0.0   ;;  %vm455_vm0 = vmmov 0   ;;  %v456_v1 = vmov 0.0   ;;  %v30_v2 = vld [vmem:[#allocation2] sm:$0xff] }
  0x15   :  { %320 = vmatprep.subr.bf16.mxu0 %v454_v0  ;;  %306 = vmatprep.mubr.msk.f32.mxu0 %vm455_vm0, %v456_v1  ;;  %v31_v3 = vld [vmem:[#allocation2 + $0x8] sm:$0xff]  ;;  %v32_v5 = vld [vmem:[#allocation2 + $0x10] sm:$0xff]  ;;  %v33_v6 = vld [vmem:[#allocation2 + $0x18] sm:$0xff]  ;;  %vm106_vm1 = vcmask 253952   ;;  %vm129_vm4 = vcmask 261120   ;;  %vm204_vm5 = vcmask 1040384  }
  0x16   :  { %326 = vmatprep.subr.bf16.mxu1 %v454_v0  ;;  %317 = vmatprep.mubr.msk.f32.mxu1 %vm455_vm0, %v456_v1  ;;  %v321_v4 = vpack.c.bf16 %v31_v3, %v30_v2  ;;  %v324_v7 = vpack.c.bf16 %v33_v6, %v32_v5  ;;  %v34_v8 = vld [vmem:[%s541_s1] sm:$0x1]  ;;  %s457_s5 = smov [#allocation6]   ;;  %s458_s7 = smov [#allocation5]  }
  0x17   :  { %s261_s6 = sshll.u32 %s457_s5, 4  ;;  %s251_s8 = sshll.u32 %s458_s7, 4  ;;  %s262_s6 = int_to_ptr.vmem [resolvable:$true] %s261_s6  ;;  %s252_s8 = int_to_ptr.vmem [resolvable:$true] %s251_s8 }
  0x18   :  { %322 = vmatpush3.bf16.xpose.msra.mxu0 %v321_v4  ;;  %328 = vmatpush3.bf16.msra.mxu1 %v321_v4  ;;  %s379_s9 = scalar_lea.vmem %s262_s6, 16  ;;  %s383_s10 = scalar_lea.vmem %s262_s6, 32 }
  0x19   :  { %323 = vmatprep.subr.bf16.mxu0 %v454_v0  ;;  %329 = vmatprep.subr.bf16.mxu1 %v454_v0  ;;  %p380_p8 = scmp.ne.s32.totalorder %s262_s6, %s379_s9  ;;  %p384_p9 = scmp.lt.s32.totalorder %s262_s6, %s262_s6 }
  0x1a   :  { %p385_p10 = scmp.lt.s32.totalorder %s383_s10, %s379_s9 }
  0x1c   :  { %331 = vmatpush3.bf16.msra.mxu1 %v324_v7  ;;  %p386_p11 = por %p385_p10, %p384_p9 }
  0x1e   :  { %p387_p12 = pnand %p386_p11, %p380_p8 }
  0x20   :  { %325 = vmatpush3.bf16.xpose.msra.mxu0 %v324_v7 }
  0x27   :  { %307 = vmatmul.mubr.f32.vlgmr.msra.gmra.mrb[0].mxu0 %v34_v8 }
  0xfa   :  { %v101_v9 = vpop.f32.mrb[0].mxu0 }
  0xfb   :  { %v308_v10 = vpop.f32.mrb[1].mxu0  ;;  %v105_v11 = vmul.f32 %v101_v9, %v101_v9 }
  0xfd   :  { %v107_v12 = vsel %vm106_vm1, %v105_v11, 0.0 }
  0xfe   :  { %108 = vadd.xlane.f32.xlu0 %v107_v12 }
 0x18b   :  { %v109_v13 = vpop.xlane.xlu0 %108 }
 0x18c   :  { %v110_v14 = vrot.slane %v109_v13, 4 }
 0x18e   :  { %v111_v15 = vadd.f32 %v110_v14, %v109_v13 }
 0x190   :  { %v112_v16 = vrot.slane %v111_v15, 2 }
 0x192   :  { %v113_v17 = vadd.f32 %v112_v16, %v111_v15 }
 0x194   :  { %v114_v18 = vrot.slane %v113_v17, 1 }
 0x196   :  { %v115_v19 = vadd.f32 %v114_v18, %v113_v17 }
 0x198   :  { %332 = vpush %v115_v19 }
 0x1c9   :  { %s333_s30 = spop %332 }
 0x1ca   :  { %v117_v20 = vstv %s333_s30 }
 0x1cb   :  { %347 = vrsqrt.f32 %v117_v20  ;;  %vm120_vm2 = vcmp.eq.f32.partialorder %v117_v20, inf  ;;  %v123_v23 = vand.u32 2147483648, %v117_v20  ;;  %vm122_vm3 = vcmp.eq.f32.partialorder %v117_v20, 0.0 }
 0x1d5   :  { %v348_v21 = vpop.eup %347 }
 0x1d6   :  { %v119_v22 = vmul.f32 %v348_v21, %v117_v20 }
 0x1d8   :  { %v121_v24 = vsel %vm120_vm2, %v117_v20, %v119_v22 }
 0x1d9   :  { %v124_v25 = vsel %vm122_vm3, %v123_v23, %v121_v24 }
 0x1da   :  { %v125_v26 = vadd.f32 1e-12, %v124_v25 }
 0x1dc   :  { %349 = vrcp.f32 %v125_v26 }
 0x1e6   :  { %v350_v27 = vpop.eup %349 }
 0x1e7   :  { %v128_v28 = vmul.f32 %v350_v27, %v101_v9 }
 0x1e9   :  { %318 = vmatmul.mubr.msk.f32.vlgmr.msra.gmra.mrb[0].mxu1 %vm129_vm4, %v128_v28  ;;  %240 = vst.msk [vmem:[#allocation6] sm:$0x1] %vm106_vm1, %v128_v28 }
 0x2bc   :  { %v199_v29 = vpop.f32.mrb[0].mxu1 }
 0x2bd   :  { %v319_v30 = vpop.f32.mrb[1].mxu1  ;;  %v203_v31 = vmul.f32 %v199_v29, %v199_v29 }
 0x2bf   :  { %v205_v32 = vsel %vm204_vm5, %v203_v31, 0.0 }
 0x2c0   :  { %206 = vadd.xlane.f32.xlu0 %v205_v32 }
 0x34d   :  { %v207_v33 = vpop.xlane.xlu0 %206 }
 0x34e   :  { %v208_v34 = vrot.slane %v207_v33, 4 }
 0x350   :  { %v209_v35 = vadd.f32 %v208_v34, %v207_v33 }
 0x352   :  { %v210_v36 = vrot.slane %v209_v35, 2 }
 0x354   :  { %v211_v37 = vadd.f32 %v210_v36, %v209_v35 }
 0x356   :  { %v212_v38 = vrot.slane %v211_v37, 1 }
 0x358   :  { %v213_v39 = vadd.f32 %v212_v38, %v211_v37 }
 0x35a   :  { %334 = vpush %v213_v39 }
 0x38b   :  { %s335_s1 = spop %334 }
 0x38c   :  { %v215_v40 = vstv %s335_s1 }
 0x38d   :  { %351 = vrsqrt.f32 %v215_v40  ;;  %vm218_vm6 = vcmp.eq.f32.partialorder %v215_v40, inf  ;;  %v221_v43 = vand.u32 2147483648, %v215_v40  ;;  %vm220_vm7 = vcmp.eq.f32.partialorder %v215_v40, 0.0 }
 0x397   :  { %v352_v41 = vpop.eup %351 }
 0x398   :  { %v217_v42 = vmul.f32 %v352_v41, %v215_v40 }
 0x39a   :  { %v219_v44 = vsel %vm218_vm6, %v215_v40, %v217_v42 }
 0x39b   :  { %v222_v45 = vsel %vm220_vm7, %v221_v43, %v219_v44 }
 0x39c   :  { %v223_v46 = vadd.f32 1e-12, %v222_v45 }
 0x39e   :  { %353 = vrcp.f32 %v223_v46 }
 0x3a8   :  { %v354_v47 = vpop.eup %353 }
 0x3a9   :  { %v226_v48 = vmul.f32 %v354_v47, %v199_v29 }
 0x3ab   :  { %v227_v49 = vmul.f32 %v226_v48, %v199_v29  ;;  %239 = vst [vmem:[#allocation5] sm:$0x1] %v226_v48 }
 0x3ad   :  { %v228_v50 = vsel %vm204_vm5, %v227_v49, 0.0 }
 0x3ae   :  { %229 = vadd.xlane.f32.xlu1 %v228_v50 }
 0x3af   :  { %390 = shalt.err (!%p387_p12)
}
 0x3b0   :  { %s391_s13 = scalar_lea.hbm %s543_s3, 16 }
 0x3b1   :  { %p392_p13 = scmp.ne.s32.totalorder %s543_s3, %s391_s13  ;;  %p395_p0 = scmp.lt.u32.totalorder %s391_s13, %s543_s3 }
 0x3b3   :  { %p397_p1 = pnand %p395_p0, %p392_p13 }
 0x3b5   :  { %400 = shalt.err (!%p397_p1)
}
 0x3b6   :  { %264 = dma.vmem_to_hbm [thread:$0]  %s262_s6, 16, %s543_s3, [#allocation7]  }
 0x3b7   :  { %s401_s20 = scalar_lea.vmem %s252_s8, 16  ;;  %s405_s21 = scalar_lea.vmem %s252_s8, 32 }
 0x3b8   :  { %p402_p2 = scmp.ne.s32.totalorder %s252_s8, %s401_s20  ;;  %p406_p3 = scmp.lt.s32.totalorder %s252_s8, %s252_s8 }
 0x3b9   :  { %p407_p4 = scmp.lt.s32.totalorder %s405_s21, %s401_s20 }
 0x3bb   :  { %p408_p5 = por %p407_p4, %p406_p3 }
 0x3bd   :  { %p409_p6 = pnand %p408_p5, %p402_p2 }
 0x3bf   :  { %412 = shalt.err (!%p409_p6)
}
 0x3c0   :  { %s413_s24 = scalar_lea.hbm %s542_s2, 16 }
 0x3c1   :  { %p414_p7 = scmp.ne.s32.totalorder %s542_s2, %s413_s24  ;;  %p417_p8 = scmp.lt.u32.totalorder %s413_s24, %s542_s2 }
 0x3c3   :  { %p419_p9 = pnand %p417_p8, %p414_p7 }
 0x3c5   :  { %422 = shalt.err (!%p419_p9)
}
 0x3c6   :  { %254 = dma.vmem_to_hbm [thread:$0]  %s252_s8, 16, %s542_s2, [#allocation4]   ;;  %vm243_vm8 = vcmask 0  }
 0x3c7   :  { %s459_s30 = smov [#allocation8]  }
 0x3c8   :  { %s271_s1 = sshll.u32 %s459_s30, 4  ;;  %s272_s1 = int_to_ptr.vmem [resolvable:$true] %s271_s1 }
 0x3c9   :  { %s423_s5 = scalar_lea.vmem %s272_s1, 16  ;;  %s427_s2 = scalar_lea.vmem %s272_s1, 32 }
 0x3ca   :  { %p424_p10 = scmp.ne.s32.totalorder %s272_s1, %s423_s5  ;;  %p428_p11 = scmp.lt.s32.totalorder %s272_s1, %s272_s1 }
 0x3cb   :  { %p429_p12 = scmp.lt.s32.totalorder %s427_s2, %s423_s5 }
 0x3cd   :  { %p430_p13 = por %p429_p12, %p428_p11 }
 0x3cf   :  { %p431_p0 = pnand %p430_p13, %p424_p10 }
 0x43b   :  { %v230_v51 = vpop.xlane.xlu1 %229 }
 0x43c   :  { %v231_v52 = vrot.slane %v230_v51, 4 }
 0x43e   :  { %v232_v53 = vadd.f32 %v231_v52, %v230_v51 }
 0x440   :  { %v233_v54 = vrot.slane %v232_v53, 2 }
 0x442   :  { %v234_v55 = vadd.f32 %v233_v54, %v232_v53 }
 0x444   :  { %v235_v56 = vrot.slane %v234_v55, 1 }
 0x446   :  { %v236_v57 = vadd.f32 %v235_v56, %v234_v55 }
 0x448   :  { %336 = vpush %v236_v57 }
 0x479   :  { %s337_s29 = spop %336 }
 0x47a   :  { %v238_v58 = vstv %s337_s29 }
 0x47b   :  { %355 = vrcp.f32 %v238_v58 }
 0x485   :  { %v356_v59 = vpop.eup %355 }
 0x486   :  { %244 = vst.msk [vmem:[#allocation8] sm:$0x1] %vm243_vm8, %v356_v59 }
 0x487   :  { %434 = shalt.err (!%p431_p0)
}
 0x488   :  { %s435_s8 = scalar_lea.hbm %s544_s4, 16 }
 0x489   :  { %p436_p1 = scmp.ne.s32.totalorder %s544_s4, %s435_s8  ;;  %p439_p2 = scmp.lt.u32.totalorder %s435_s8, %s544_s4 }
 0x48b   :  { %p441_p3 = pnand %p439_p2, %p436_p1 }
 0x48d   :  { %444 = shalt.err (!%p441_p3)
}
 0x48e   :  { %274 = dma.vmem_to_hbm [thread:$0]  %s272_s1, 16, %s544_s4, [#allocation7]  }
 0x48f   :  { %447 = dma.done.wait [#allocation4], 16  }
 0x490   :  { %448 = vsyncadd [#allocation4], 4294967280 }
 0x491   :  { %449 = dma.done.wait [#allocation7], 32  }
 0x492   :  { %450 = vsyncadd [#allocation7], 4294967264 }
 0x493   :  { %284 = vsyncpa [#allocation3], 1 }
 0x494   :  { %285 = vsyncpa [#allocation4], 1 }
 0x495   :  { %286 = vsyncpa [#allocation7], 1 }

</bundles_post_ra>
